<compile_context>
chip_gen: v7x
topology: tpu7x:2x2x1
jax: 0.10.0
libtpu: 0.0.40
codegen_flags: <defaults>
</compile_context>

<pallas_src>
import functools

import jax
import jax.numpy as jnp
from jax.experimental import pallas as pl
from jax.experimental.pallas import tpu as pltpu


def fpn_block_kernel(x_ref, s_ref, w_ref, b_ref, o_ref):
    # x_ref : (th, W, P)        pre-upsample pyramid rows (compute dtype)
    # s_ref : (2*th*W, 2*Cs)    skip rows; lanes = [even-col chans | odd-col chans]
    # w_ref : (Cs, P)           1x1 conv weight with BN scale folded in
    # b_ref : (1, P)            folded BN bias (f32)
    # o_ref : (2*th*W, 2*P)     output rows; lanes = [even-col chans | odd-col chans]
    th, W, P = x_ref.shape
    Cs = w_ref.shape[0]
    rows = 2 * th * W

    s = s_ref[...]
    w = w_ref[...]
    b = b_ref[...]

    # Fused 2x nearest upsample of x: height doubling stays a broadcast inside
    # the add (xf is only th*W*P f32, not 2x), width doubling is free via the
    # even/odd lane packing (same xf feeds both halves).  The (rows,P) <->
    # (th,2,W,P) reshapes are relayout-free when W % 8 == 0.
    xf = x_ref[...].astype(jnp.float32)[:, None]          # (th, 1, W, P)

    def half(s_half):
        y = jnp.dot(s_half, w, preferred_element_type=jnp.float32)
        y = jnp.maximum(y + b, 0.0)                        # folded BN + ReLU
        y = (y.reshape(th, 2, W, P) + xf).reshape(rows, P)
        return y.astype(o_ref.dtype)

    # Two direct half-stores -- no concat temporary, unmasked vst when
    # P % 128 == 0 (real FPN: P = 256, Cs in {256, 512, 1024, 2048}).
    o_ref[:, pl.ds(0, P)] = half(s[:, :Cs])                # even output columns
    o_ref[:, pl.ds(P, P)] = half(s[:, Cs:])                # odd output columns


def _vmem_budgets():
    """(row-tile VMEM budget, vmem_limit_bytes) tuned per TPU generation."""
    kind = ""
    try:
        kind = jax.devices()[0].device_kind.lower()
    except Exception:
        pass
    if "v7" in kind:
        # v7x: 64 MiB physical VMEM per TensorCore -> stay conservative.
        return 20 * 1024 * 1024, 48 * 1024 * 1024
    if any(v in kind for v in ("v4", "v5", "v6")):
        # 128 MiB physical VMEM -> larger tiles amortize per-step overhead.
        return 48 * 1024 * 1024, 100 * 1024 * 1024
    return 20 * 1024 * 1024, 48 * 1024 * 1024


def _pick_row_tile(n_rows_in, W, P, Cs, in_bytes, out_bytes, sub, vmem_budget):
    """Largest input-row tile whose VMEM footprint (double-buffered DMA blocks
    PLUS kernel-internal f32 temporaries) fits `vmem_budget`, divides the input
    row count, keeps the output sublane dim `sub`-aligned (16 for bf16, 8 for
    f32), and leaves a grid of >= 2 steps (v7x megacore / pipelining)."""
    # Double-buffered DMA blocks, per input row:
    #   x: (W,P), skip: (2W,2Cs), out: (2W,2P)
    dma_row = W * P * in_bytes + 4 * W * Cs * in_bytes + 4 * W * P * out_bytes
    # Kernel-internal f32 temporaries per input row: xf (W*P*4) plus the two
    # matmul / epilogue results (~16*W*P).
    tmp_row = 20 * W * P
    per_row = 2 * dma_row + tmp_row
    fixed = 2 * (Cs * P * in_bytes + P * 4)                # weight + bias bufs
    budget = max(vmem_budget - fixed, per_row)
    max_th = max(1, int(budget // per_row))

    def ok(th, need_align):
        if n_rows_in % th:
            return False
        if need_align and (2 * th * W) % sub:
            return False
        if n_rows_in >= 2 and th == n_rows_in:             # keep grid >= 2
            return False
        return True

    for need_align in (True, False):                       # relax alignment
        for th in range(min(max_th, n_rows_in), 0, -1):    # before giving up
            if ok(th, need_align):
                return th
    return n_rows_in                                       # true last resort


@functools.partial(
    jax.jit, static_argnames=("eps", "compute_dtype", "nchw_output"))
def fpn_block_forward(x_nchw, skip_nchw, conv_w, bn_gamma, bn_beta, bn_mean,
                      bn_var, eps=1e-5, compute_dtype=jnp.bfloat16,
                      nchw_output=True):
    N, P, H, W = x_nchw.shape
    Ns, Cs, Ho, Wo = skip_nchw.shape
    assert Ns == N and Ho == 2 * H and Wo == 2 * W
    result_dtype = x_nchw.dtype

    # --- fold BatchNorm (running stats) into the conv weight and a bias -----
    # TODO(synk): BatchNorm is folded in inference mode (running statistics);
    # a train()-mode module using batch statistics would differ.
    scale = (bn_gamma / jnp.sqrt(bn_var + eps)).astype(jnp.float32)      # (P,)
    bias = (bn_beta - bn_mean * scale).astype(jnp.float32)               # (P,)
    w2d = (conv_w[:, :, 0, 0].astype(jnp.float32) * scale[:, None]).T    # (Cs, P)
    w2d = w2d.astype(compute_dtype)
    bias2d = bias.reshape(1, P)

    # --- layout glue (no upsample materialization) ---------------------------
    # TODO(synk): these transposes disappear entirely if the caller already
    # holds x / skip channels-last.
    x_rows = jnp.transpose(x_nchw, (0, 2, 3, 1)).astype(compute_dtype)
    x_rows = x_rows.reshape(N * H, W, P)                                 # (N*H, W, P)
    s_rows = jnp.transpose(skip_nchw, (0, 2, 3, 1)).astype(compute_dtype)
    s_rows = s_rows.reshape(N * Ho * W, 2 * Cs)                          # (N*2H*W, 2*Cs)

    in_bytes = jnp.dtype(compute_dtype).itemsize
    out_bytes = in_bytes                       # kernel emits compute dtype
    sub = 16 if in_bytes == 2 else 8           # bf16 packs 16 rows / vreg
    vmem_budget, vmem_limit = _vmem_budgets()
    th = _pick_row_tile(N * H, W, P, Cs, in_bytes, out_bytes, sub, vmem_budget)
    rows_out = 2 * th * W
    grid = (N * H // th,)

    rows_total = N * Ho * W
    cost = pl.CostEstimate(
        flops=4 * rows_total * Cs * P + 6 * rows_total * P,
        transcendentals=0,
        bytes_accessed=(x_rows.size * in_bytes + s_rows.size * in_bytes
                        + w2d.size * in_bytes + bias2d.size * 4
                        + rows_total * 2 * P * out_bytes))

    out2d = pl.pallas_call(
        fpn_block_kernel,
        out_shape=jax.ShapeDtypeStruct((rows_total, 2 * P), compute_dtype),
        grid=grid,
        in_specs=[
            pl.BlockSpec((th, W, P), lambda i: (i, 0, 0)),         # x (pre-upsample)
            pl.BlockSpec((rows_out, 2 * Cs), lambda i: (i, 0)),    # skip
            pl.BlockSpec((Cs, P), lambda i: (0, 0)),               # folded conv weight
            pl.BlockSpec((1, P), lambda i: (0, 0)),                # folded BN bias
        ],
        out_specs=pl.BlockSpec((rows_out, 2 * P), lambda i: (i, 0)),
        compiler_params=pltpu.CompilerParams(
            dimension_semantics=("parallel",),
            vmem_limit_bytes=vmem_limit),
        cost_estimate=cost,
    )(x_rows, s_rows, w2d, bias2d)

    if nchw_output:
        out = out2d.reshape(N, Ho, W, 2, P).transpose(0, 4, 1, 2, 3)
        out = out.reshape(N, P, Ho, Wo)
    else:
        # Channels-last output is free: the lane packing already interleaves
        # even/odd columns in the right order.
        out = out2d.reshape(N, Ho, Wo, P)
    return out.astype(result_dtype)


def fpn_block_reference(x_nchw, skip_nchw, conv_w, bn_gamma, bn_beta, bn_mean,
                        bn_var, eps=1e-5):
    """Pure-JAX reference mirroring the PyTorch module (BN in eval mode)."""
    x_up = jnp.repeat(jnp.repeat(x_nchw, 2, axis=2), 2, axis=3)
    w2d = conv_w[:, :, 0, 0]                                             # (P, Cs)
    y = jnp.einsum('nchw,pc->nphw', skip_nchw, w2d,
                   precision=jax.lax.Precision.HIGHEST)
    scale = bn_gamma / jnp.sqrt(bn_var + eps)
    bias = bn_beta - bn_mean * scale
    y = y * scale[None, :, None, None] + bias[None, :, None, None]
    y = jnp.maximum(y, 0.0)
    return x_up + y


if __name__ == "__main__":
    # small shapes consistent with the module
    N, P, Cs, H, W = 2, 8, 4, 8, 8          # pyramid_channels=8, skip_channels=4
    key = jax.random.PRNGKey(0)
    k1, k2, k3, k4, k5, k6, k7 = jax.random.split(key, 7)

    x = jax.random.normal(k1, (N, P, H, W), jnp.float32)
    skip = jax.random.normal(k2, (N, Cs, 2 * H, 2 * W), jnp.float32)

    conv_w = jax.random.normal(k3, (P, Cs, 1, 1), jnp.float32) * 0.1     # (out,in,1,1)
    bn_gamma = 1.0 + 0.1 * jax.random.normal(k4, (P,), jnp.float32)
    bn_beta = 0.1 * jax.random.normal(k5, (P,), jnp.float32)
    bn_mean = 0.1 * jax.random.normal(k6, (P,), jnp.float32)
    bn_var = jax.nn.softplus(jax.random.normal(k7, (P,), jnp.float32)) + 0.5

    ref = fpn_block_reference(x, skip, conv_w, bn_gamma, bn_beta, bn_mean, bn_var)

    # f32 compute path: tight correctness check.
    out_f32 = fpn_block_forward(x, skip, conv_w, bn_gamma, bn_beta, bn_mean,
                                bn_var, compute_dtype=jnp.float32)
    out_f32 = jax.block_until_ready(out_f32)
    assert out_f32.shape == (N, P, 2 * H, 2 * W)
    assert jnp.allclose(out_f32, ref, atol=2e-3, rtol=2e-3), "f32 mismatch vs reference"

    # bf16 streamed-operand / bf16-output path (default, mem-bandwidth optimized).
    out_bf16 = fpn_block_forward(x, skip, conv_w, bn_gamma, bn_beta, bn_mean,
                                 bn_var)
    out_bf16 = jax.block_until_ready(out_bf16)
    assert out_bf16.shape == (N, P, 2 * H, 2 * W)
    assert jnp.allclose(out_bf16, ref, atol=6e-2, rtol=5e-2), "bf16 mismatch vs reference"

    print("KERNEL_OK")
</pallas_src>

<mosaic_0001>
module attributes {stable_mosaic.version = 11 : i64} {
  func.func @fpn_block_kernel(%arg0: i32, %arg1: memref<8x8x8xf32, #tpu.memory_space<vmem>>, %arg2: memref<128x8xf32, #tpu.memory_space<vmem>>, %arg3: memref<4x8xf32, #tpu.memory_space<vmem>>, %arg4: memref<1x8xf32, #tpu.memory_space<vmem>>, %arg5: memref<128x16xf32, #tpu.memory_space<vmem>>) attributes {dimension_semantics = [#tpu.dimension_semantics<parallel>], iteration_bounds = array<i64: 2>, scalar_prefetch = 0 : i64, scratch_operands = 0 : i64, tpu.core_type = #tpu.core_type<tc>, window_params = [{transform_indices = @transform_0, window_bounds = array<i64: 8, 8, 8>}, {transform_indices = @transform_1, window_bounds = array<i64: 128, 8>}, {pipeline_mode = #tpu.pipeline_mode<synchronous>, transform_indices = @transform_2, window_bounds = array<i64: 4, 8>}, {pipeline_mode = #tpu.pipeline_mode<synchronous>, transform_indices = @transform_3, window_bounds = array<i64: 1, 8>}, {transform_indices = @transform_4, window_bounds = array<i64: 128, 16>}]} {
    %c0 = arith.constant 0 : index
    %c0_0 = arith.constant 0 : index
    %0 = vector.load %arg2[%c0, %c0_0] : memref<128x8xf32, #tpu.memory_space<vmem>>, vector<128x8xf32>
    %c0_1 = arith.constant 0 : index
    %c0_2 = arith.constant 0 : index
    %1 = vector.load %arg3[%c0_1, %c0_2] : memref<4x8xf32, #tpu.memory_space<vmem>>, vector<4x8xf32>
    %c0_3 = arith.constant 0 : index
    %c0_4 = arith.constant 0 : index
    %2 = vector.load %arg4[%c0_3, %c0_4] : memref<1x8xf32, #tpu.memory_space<vmem>>, vector<1x8xf32>
    %c0_5 = arith.constant 0 : index
    %c0_6 = arith.constant 0 : index
    %c0_7 = arith.constant 0 : index
    %3 = vector.load %arg1[%c0_5, %c0_6, %c0_7] : memref<8x8x8xf32, #tpu.memory_space<vmem>>, vector<8x8x8xf32>
    %4 = vector.shape_cast %3 : vector<8x8x8xf32> to vector<8x1x8x8xf32>
    %5 = vector.extract_strided_slice %0 {offsets = [0, 0], sizes = [128, 4], strides = [1, 1]} : vector<128x8xf32> to vector<128x4xf32>
    %cst = arith.constant dense<0.000000e+00> : vector<128x8xf32>
    %6 = tpu.matmul %5, %1, %cst {dimension_numbers = #tpu.dot_dimension_numbers<[1], [0], [0], [1], [0, 0, 1, 1], [], []>} : vector<128x4xf32>, vector<4x8xf32>, vector<128x8xf32> -> vector<128x8xf32>
    %7 = vector.broadcast %2 : vector<1x8xf32> to vector<128x8xf32>
    %8 = arith.addf %6, %7 : vector<128x8xf32>
    %cst_8 = arith.constant 0.000000e+00 : f32
    %9 = vector.broadcast %cst_8 : f32 to vector<128x8xf32>
    %10 = arith.maximumf %8, %9 : vector<128x8xf32>
    %11 = vector.shape_cast %10 : vector<128x8xf32> to vector<8x2x8x8xf32>
    %12 = vector.broadcast %4 : vector<8x1x8x8xf32> to vector<8x2x8x8xf32>
    %13 = arith.addf %11, %12 : vector<8x2x8x8xf32>
    %14 = vector.shape_cast %13 : vector<8x2x8x8xf32> to vector<128x8xf32>
    %c0_9 = arith.constant 0 : index
    %c0_10 = arith.constant 0 : index
    %15 = vector.load %arg5[%c0_9, %c0_10] : memref<128x16xf32, #tpu.memory_space<vmem>>, vector<128x8xf32>
    tpu.vector_store %arg5[%c0_9, %c0_10], %14 {strides = array<i32>} : memref<128x16xf32, #tpu.memory_space<vmem>>, vector<128x8xf32>,
    %16 = vector.extract_strided_slice %0 {offsets = [0, 4], sizes = [128, 4], strides = [1, 1]} : vector<128x8xf32> to vector<128x4xf32>
    %cst_11 = arith.constant dense<0.000000e+00> : vector<128x8xf32>
    %17 = tpu.matmul %16, %1, %cst_11 {dimension_numbers = #tpu.dot_dimension_numbers<[1], [0], [0], [1], [0, 0, 1, 1], [], []>} : vector<128x4xf32>, vector<4x8xf32>, vector<128x8xf32> -> vector<128x8xf32>
    %18 = vector.broadcast %2 : vector<1x8xf32> to vector<128x8xf32>
    %19 = arith.addf %17, %18 : vector<128x8xf32>
    %cst_12 = arith.constant 0.000000e+00 : f32
    %20 = vector.broadcast %cst_12 : f32 to vector<128x8xf32>
    %21 = arith.maximumf %19, %20 : vector<128x8xf32>
    %22 = vector.shape_cast %21 : vector<128x8xf32> to vector<8x2x8x8xf32>
    %23 = vector.broadcast %4 : vector<8x1x8x8xf32> to vector<8x2x8x8xf32>
    %24 = arith.addf %22, %23 : vector<8x2x8x8xf32>
    %25 = vector.shape_cast %24 : vector<8x2x8x8xf32> to vector<128x8xf32>
    %c0_13 = arith.constant 0 : index
    %c8 = arith.constant 8 : index
    %26 = vector.load %arg5[%c0_13, %c8] : memref<128x16xf32, #tpu.memory_space<vmem>>, vector<128x8xf32>
    tpu.vector_store %arg5[%c0_13, %c8], %25 {strides = array<i32>} : memref<128x16xf32, #tpu.memory_space<vmem>>, vector<128x8xf32>,
    return
  }
  func.func @transform_0(%arg0: i32) -> (i32, i32, i32) {
    %c0_i32 = arith.constant 0 : i32
    %c0_i32_0 = arith.constant 0 : i32
    %c0_i32_1 = arith.constant 0 : i32
    return %arg0, %c0_i32, %c0_i32_0 : i32, i32, i32
  }
  func.func @transform_1(%arg0: i32) -> (i32, i32) {
    %c0_i32 = arith.constant 0 : i32
    %c0_i32_0 = arith.constant 0 : i32
    return %arg0, %c0_i32 : i32, i32
  }
  func.func @transform_2(%arg0: i32) -> (i32, i32) {
    %c0_i32 = arith.constant 0 : i32
    %c0_i32_0 = arith.constant 0 : i32
    %c0_i32_1 = arith.constant 0 : i32
    return %c0_i32, %c0_i32_0 : i32, i32
  }
  func.func @transform_3(%arg0: i32) -> (i32, i32) {
    %c0_i32 = arith.constant 0 : i32
    %c0_i32_0 = arith.constant 0 : i32
    %c0_i32_1 = arith.constant 0 : i32
    return %c0_i32, %c0_i32_0 : i32, i32
  }
  func.func @transform_4(%arg0: i32) -> (i32, i32) {
    %c0_i32 = arith.constant 0 : i32
    %c0_i32_0 = arith.constant 0 : i32
    return %arg0, %c0_i32 : i32, i32
  }
}

</mosaic_0001>

<bundles_post_ra>
// kernel: fpn_block_forward.1
= control target key start
LH: loop header
LB: loop body
LE: loop exit
PB: predicated region body
PF: predicated region fallthrough
CT: control target
= control target key end

     0   :  { %s1071_s15 = smov 0   ;;  %s1336_s0 = inlined_call_operand.vmem [shape: f32[16,8,8], index: 0, kind: input, shape index: {}]   ;;  %s1337_s1 = inlined_call_operand.vmem [shape: f32[256,8], index: 1, kind: input, shape index: {}]   ;;  %s1338_s2 = inlined_call_operand.vmem [shape: f32[4,8], index: 2, kind: input, shape index: {}]   ;;  %s1339_s3 = inlined_call_operand.vmem [shape: f32[1,8], index: 3, kind: input, shape index: {}]   ;;  %s1340_s4 = inlined_call_operand.vmem [shape: f32[256,16], index: 4, kind: output, shape index: {}]  }
   0x1 LB: > { %s892_s16 = sadd.s32 4294967295, %s1042_s15   ;;  %p896_p0 = scmp.ge.s32.totalorder %s1042_s15, 1  ;;  %s1042_s15 = sphi %s1071_s15, %s14_s15  }
   0x2   : > { %p174_p1 = scmp.lt.s32.totalorder %s1042_s15, 3 }
   0x4   : > { %p175_p2 = pnand %p896_p0, %p174_p1 }
   0x5   : > { %s899_s17 = sshll.u32 (!%p175_p2), %s892_s16, 4  ;;  %v239_v0 = vld [vmem:[%s1338_s2] sm:$0xf] (!%p175_p2)  ;;  %vm304_vm0 = vcmask (!%p175_p2), 1043456   ;;  %s1044_s24 = smov (!%p175_p2), 124   ;;  %vm255_vm1 = vcmask (!%p175_p2), 31744  }
   0x6   : > { %178 = sbr.rel (%p175_p2) target bundleno = 499 (0x1f3), region = 36  ;;  %p212_p3 = scmp.lt.s32.totalorder (!%p175_p2), %s899_s17, 31  ;;  %1000 = vmatprep.subr.msk.mxu1 (!%p175_p2), %vm304_vm0, %v239_v0  ;;  %974 = vmatprep.subr.msk.mxu0 (!%p175_p2), %vm304_vm0, %v239_v0  ;;  %v1163_v33 = vld [vmem:[%s1339_s3] ss:$0 sm:$0xff] (!%p175_p2)  ;;  %vm485_vm2 = vcmask (!%p175_p2), 64512   ;;  %vm807_vm3 = vcmask (!%p175_p2), 130112  }
   0x7   : > { %1001 = vmatpush3.msk.msra.mxu1 (!%p175_p2), %vm304_vm0, %v239_v0  ;;  %975 = vmatpush3.msk.msra.mxu0 (!%p175_p2), %vm304_vm0, %v239_v0  ;;  %s897_s25 = sshll.u32 (!%p175_p2), %s892_s16, 3  ;;  %s1045_s9 = smov (!%p175_p2), 8  }
   0x8   : > { %p206_p4 = scmp.lt.s32.totalorder (!%p175_p2), %s897_s25, 15 }
   0xd   : > { %s1342_s17 = smov (!%p212_p3, %s899_s17), 31  ;;  %s1344_s25 = smov (!%p206_p4, %s897_s25), 15 }
   0xe   : > { %s900_s20 = sshll.u32 %s1342_s17, 3  ;;  %s898_s26 = sshll.u32 %s1344_s25, 3 }
   0xf   : > { %s1092_s23 = scalar_lea.vmem %s1337_s1, %s900_s20  ;;  %s1168_s5 = scalar_lea.vmem %s1336_s0, %s898_s26 }
  0x10   : > { %v223_v1 = vld [vmem:[%s1092_s23] sm:$0xff]  ;;  %v225_v2 = vld [vmem:[%s1092_s23 + $0x10] sm:$0xff]  ;;  %v224_v3 = vld [vmem:[%s1092_s23 + $0x8] sm:$0xff]  ;;  %s1178_s8 = scalar_lea.vmem %s1340_s4, %s900_s20 }
  0x11   : > { %502 = vrot.lane.b32.xlu0 %v223_v1, %s1044_s24  ;;  %506 = vrot.lane.b32.xlu1 %v225_v2, %s1044_s24  ;;  %v226_v4 = vld [vmem:[%s1092_s23 + $0x18] sm:$0xff]  ;;  %v227_v5 = vld [vmem:[%s1092_s23 + $0x20] sm:$0xff] }
  0x12   : > { %976 = vmatprep.mubr.msk.f32.mxu0 %vm255_vm1, %v223_v1  ;;  %v228_v6 = vld [vmem:[%s1092_s23 + $0x28] sm:$0xff]  ;;  %v229_v7 = vld [vmem:[%s1092_s23 + $0x30] sm:$0xff]  ;;  %v230_v8 = vld [vmem:[%s1092_s23 + $0x38] sm:$0xff] }
  0x13   : > { %977 = vmatmul.mubr.msk.f32.vlgmr.msra.gmra.mrb[0].mxu0 %vm255_vm1, %v224_v3  ;;  %v231_v9 = vld [vmem:[%s1092_s23 + $0x40] sm:$0xff]  ;;  %v232_v10 = vld [vmem:[%s1092_s23 + $0x48] sm:$0xff]  ;;  %v233_v11 = vld [vmem:[%s1092_s23 + $0x50] sm:$0xff] }
  0x14   : > { %979 = vmatprep.mubr.msk.f32.mxu0 %vm255_vm1, %v225_v2  ;;  %v234_v12 = vld [vmem:[%s1092_s23 + $0x58] sm:$0xff]  ;;  %v235_v13 = vld [vmem:[%s1092_s23 + $0x60] sm:$0xff]  ;;  %v236_v14 = vld [vmem:[%s1092_s23 + $0x68] sm:$0xff] }
  0x15   : > { %504 = vrot.lane.b32.xlu0 %v224_v3, %s1044_s24  ;;  %508 = vrot.lane.b32.xlu1 %v226_v4, %s1044_s24  ;;  %v237_v15 = vld [vmem:[%s1092_s23 + $0x70] sm:$0xff]  ;;  %v238_v16 = vld [vmem:[%s1092_s23 + $0x78] sm:$0xff] }
  0x16   : > { %v241_v42 = vld [vmem:[%s1168_s5] sm:$0xff]  ;;  %v1184_v49 = vld [vmem:[%s1168_s5 + $0x8] sm:$0xff]  ;;  %v1190_v54 = vld [vmem:[%s1168_s5 + $0x10] sm:$0xff] }
  0x17   : > { %980 = vmatmul.mubr.msk.f32.gmra.mrb[2].mxu0 %vm255_vm1, %v226_v4  ;;  %v1205_v0 = vld [vmem:[%s1168_s5 + $0x18] sm:$0xff] }
  0x18   : > { %982 = vmatprep.mubr.msk.f32.mxu0 %vm255_vm1, %v227_v5 }
  0x19   : > { %510 = vrot.lane.b32.xlu0 %v227_v5, %s1044_s24  ;;  %512 = vrot.lane.b32.xlu1 %v228_v6, %s1044_s24 }
  0x1b   : > { %983 = vmatmul.mubr.msk.f32.gmra.mrb[4].mxu0 %vm255_vm1, %v228_v6 }
  0x1c   : > { %985 = vmatprep.mubr.msk.f32.mxu0 %vm255_vm1, %v229_v7 }
  0x1d   : > { %514 = vrot.lane.b32.xlu0 %v229_v7, %s1044_s24  ;;  %516 = vrot.lane.b32.xlu1 %v230_v8, %s1044_s24 }
  0x1f   : > { %986 = vmatmul.mubr.msk.f32.gmra.mrb[6].mxu0 %vm255_vm1, %v230_v8 }
  0x20   : > { %988 = vmatprep.mubr.msk.f32.mxu0 %vm255_vm1, %v231_v9 }
  0x21   : > { %518 = vrot.lane.b32.xlu0 %v231_v9, %s1044_s24  ;;  %520 = vrot.lane.b32.xlu1 %v232_v10, %s1044_s24 }
  0x23   : > { %989 = vmatmul.mubr.msk.f32.gmra.mrb[8].mxu0 %vm255_vm1, %v232_v10 }
  0x24   : > { %991 = vmatprep.mubr.msk.f32.mxu0 %vm255_vm1, %v233_v11 }
  0x25   : > { %522 = vrot.lane.b32.xlu0 %v233_v11, %s1044_s24  ;;  %524 = vrot.lane.b32.xlu1 %v234_v12, %s1044_s24 }
  0x27   : > { %992 = vmatmul.mubr.msk.f32.gmra.mrb[10].mxu0 %vm255_vm1, %v234_v12 }
  0x28   : > { %994 = vmatprep.mubr.msk.f32.mxu0 %vm255_vm1, %v235_v13 }
  0x29   : > { %526 = vrot.lane.b32.xlu0 %v235_v13, %s1044_s24  ;;  %528 = vrot.lane.b32.xlu1 %v236_v14, %s1044_s24 }
  0x2b   : > { %995 = vmatmul.mubr.msk.f32.gmra.mrb[12].mxu0 %vm255_vm1, %v236_v14  ;;  %v1218_v14 = vld [vmem:[%s1168_s5 + $0x20] sm:$0xff] }
  0x2c   : > { %997 = vmatprep.mubr.msk.f32.mxu0 %vm255_vm1, %v237_v15 }
  0x2d   : > { %530 = vrot.lane.b32.xlu0 %v237_v15, %s1044_s24  ;;  %532 = vrot.lane.b32.xlu1 %v238_v16, %s1044_s24 }
  0x2f   : > { %998 = vmatmul.mubr.msk.f32.gmra.mrb[14].mxu0 %vm255_vm1, %v238_v16 }
  0x83   : > { %v503_v17 = vpop.permute.xlu0 %502  ;;  %v507_v18 = vpop.permute.xlu1 %506 }
  0x84   : > { %1002 = vmatprep.mubr.msk.f32.mxu1 %vm255_vm1, %v503_v17 }
  0x87   : > { %v505_v19 = vpop.permute.xlu0 %504  ;;  %v509_v20 = vpop.permute.xlu1 %508 }
  0x88   : > { %1003 = vmatmul.mubr.msk.f32.vlgmr.msra.gmra.mrb[0].mxu1 %vm255_vm1, %v505_v19 }
  0x89   : > { %1005 = vmatprep.mubr.msk.f32.mxu1 %vm255_vm1, %v507_v18 }
  0x8b   : > { %v511_v21 = vpop.permute.xlu0 %510  ;;  %v513_v22 = vpop.permute.xlu1 %512 }
  0x8c   : > { %1006 = vmatmul.mubr.msk.f32.gmra.mrb[2].mxu1 %vm255_vm1, %v509_v20 }
  0x8d   : > { %1008 = vmatprep.mubr.msk.f32.mxu1 %vm255_vm1, %v511_v21 }
  0x8f   : > { %v515_v23 = vpop.permute.xlu0 %514  ;;  %v517_v24 = vpop.permute.xlu1 %516 }
  0x90   : > { %1009 = vmatmul.mubr.msk.f32.gmra.mrb[4].mxu1 %vm255_vm1, %v513_v22 }
  0x91   : > { %1011 = vmatprep.mubr.msk.f32.mxu1 %vm255_vm1, %v515_v23 }
  0x93   : > { %v519_v25 = vpop.permute.xlu0 %518  ;;  %v521_v26 = vpop.permute.xlu1 %520 }
  0x94   : > { %1012 = vmatmul.mubr.msk.f32.gmra.mrb[6].mxu1 %vm255_vm1, %v517_v24 }
  0x95   : > { %1014 = vmatprep.mubr.msk.f32.mxu1 %vm255_vm1, %v519_v25 }
  0x97   : > { %v523_v27 = vpop.permute.xlu0 %522  ;;  %v525_v28 = vpop.permute.xlu1 %524 }
  0x98   : > { %1015 = vmatmul.mubr.msk.f32.gmra.mrb[8].mxu1 %vm255_vm1, %v521_v26 }
  0x99   : > { %1017 = vmatprep.mubr.msk.f32.mxu1 %vm255_vm1, %v523_v27 }
  0x9b   : > { %v527_v29 = vpop.permute.xlu0 %526  ;;  %v529_v30 = vpop.permute.xlu1 %528 }
  0x9c   : > { %1018 = vmatmul.mubr.msk.f32.gmra.mrb[10].mxu1 %vm255_vm1, %v525_v28 }
  0x9d   : > { %1020 = vmatprep.mubr.msk.f32.mxu1 %vm255_vm1, %v527_v29 }
  0x9f   : > { %v531_v31 = vpop.permute.xlu0 %530  ;;  %v533_v32 = vpop.permute.xlu1 %532 }
  0xa0   : > { %1021 = vmatmul.mubr.msk.f32.gmra.mrb[12].mxu1 %vm255_vm1, %v529_v30 }
  0xa1   : > { %1023 = vmatprep.mubr.msk.f32.mxu1 %vm255_vm1, %v531_v31  ;;  %v1232_v31 = vld [vmem:[%s1168_s5 + $0x28] sm:$0xff] }
  0xa4   : > { %1024 = vmatmul.mubr.msk.f32.gmra.mrb[14].mxu1 %vm255_vm1, %v533_v32 }
  0xe6   : > { %v978_v34 = vpop.f32.mrb[0].mxu0 }
  0xe7   : > { %v380_v35 = vadd.f32 %v978_v34, %v1163_v33  ;;  %v374_v36 = vpop.f32.mrb[1].mxu0 }
  0xe8   : > { %v375_v37 = vadd.f32 %v1163_v33, %v374_v36 }
  0xe9   : > { %v454_v39 = vmax.f32 %v380_v35, 0.0 }
  0xea   : > { %v981_v38 = vpop.f32.mrb[2].mxu0  ;;  %v453_v43 = vmax.f32 %v375_v37, 0.0 }
  0xeb   : > { %v390_v40 = vadd.f32 %v981_v38, %v1163_v33  ;;  %v384_v41 = vpop.f32.mrb[3].mxu0  ;;  %v470_v46 = vadd.f32 %v454_v39, %v241_v42 }
  0xec   : > { %v385_v44 = vadd.f32 %v1163_v33, %v384_v41  ;;  %v469_v50 = vadd.f32 %v453_v43, %v241_v42 }
  0xed   : > { %v456_v47 = vmax.f32 %v390_v40, 0.0  ;;  %487 = vst.msk [vmem:[%s1178_s8 + $0x8] sm:$0xff] %vm485_vm2, %v470_v46 }
  0xee   : > { %v984_v45 = vpop.f32.mrb[4].mxu0  ;;  %v455_v51 = vmax.f32 %v385_v44, 0.0  ;;  %486 = vst.msk [vmem:[%s1178_s8] sm:$0xff] %vm485_vm2, %v469_v50  ;;  %v1249_v50 = vld [vmem:[%s1168_s5 + $0x30] sm:$0xff] }
  0xef   : > { %v400_v48 = vadd.f32 %v984_v45, %v1163_v33  ;;  %v472_v52 = vadd.f32 %v456_v47, %v1184_v49  ;;  %v394_v57 = vpop.f32.mrb[5].mxu0 }
  0xf0   : > { %v471_v55 = vadd.f32 %v455_v51, %v1184_v49  ;;  %v395_v58 = vadd.f32 %v1163_v33, %v394_v57 }
  0xf1   : > { %v458_v53 = vmax.f32 %v400_v48, 0.0  ;;  %489 = vst.msk [vmem:[%s1178_s8 + $0x18] sm:$0xff] %vm485_vm2, %v472_v52 }
  0xf2   : > { %488 = vst.msk [vmem:[%s1178_s8 + $0x10] sm:$0xff] %vm485_vm2, %v471_v55  ;;  %v987_v59 = vpop.f32.mrb[6].mxu0  ;;  %v457_v61 = vmax.f32 %v395_v58, 0.0 }
  0xf3   : > { %v474_v56 = vadd.f32 %v458_v53, %v1190_v54  ;;  %v410_v60 = vadd.f32 %v987_v59, %v1163_v33  ;;  %v404_v63 = vpop.f32.mrb[7].mxu0 }
  0xf4   : > { %v473_v1 = vadd.f32 %v457_v61, %v1190_v54  ;;  %v405_v2 = vadd.f32 %v1163_v33, %v404_v63 }
  0xf5   : > { %491 = vst.msk [vmem:[%s1178_s8 + $0x28] sm:$0xff] %vm485_vm2, %v474_v56  ;;  %v460_v62 = vmax.f32 %v410_v60, 0.0 }
  0xf6   : > { %v990_v3 = vpop.f32.mrb[8].mxu0  ;;  %490 = vst.msk [vmem:[%s1178_s8 + $0x20] sm:$0xff] %vm485_vm2, %v473_v1  ;;  %v459_v9 = vmax.f32 %v405_v2, 0.0 }
  0xf7   : > { %v476_v5 = vadd.f32 %v460_v62, %v1205_v0  ;;  %v420_v6 = vadd.f32 %v990_v3, %v1163_v33  ;;  %v414_v12 = vpop.f32.mrb[9].mxu0 }
  0xf8   : > { %v475_v15 = vadd.f32 %v459_v9, %v1205_v0  ;;  %v415_v16 = vadd.f32 %v1163_v33, %v414_v12 }
  0xf9   : > { %493 = vst.msk [vmem:[%s1178_s8 + $0x38] sm:$0xff] %vm485_vm2, %v476_v5  ;;  %v462_v11 = vmax.f32 %v420_v6, 0.0 }
  0xfa   : > { %v993_v17 = vpop.f32.mrb[10].mxu0  ;;  %492 = vst.msk [vmem:[%s1178_s8 + $0x30] sm:$0xff] %vm485_vm2, %v475_v15  ;;  %v461_v25 = vmax.f32 %v415_v16, 0.0 }
  0xfb   : > { %v478_v20 = vadd.f32 %v462_v11, %v1218_v14  ;;  %v430_v21 = vadd.f32 %v993_v17, %v1163_v33  ;;  %v424_v29 = vpop.f32.mrb[11].mxu0 }
  0xfc   : > { %v477_v32 = vadd.f32 %v461_v25, %v1218_v14  ;;  %v425_v34 = vadd.f32 %v1163_v33, %v424_v29 }
  0xfd   : > { %495 = vst.msk [vmem:[%s1178_s8 + $0x48] sm:$0xff] %vm485_vm2, %v478_v20  ;;  %v464_v28 = vmax.f32 %v430_v21, 0.0 }
  0xfe   : > { %v996_v35 = vpop.f32.mrb[12].mxu0  ;;  %494 = vst.msk [vmem:[%s1178_s8 + $0x40] sm:$0xff] %vm485_vm2, %v477_v32  ;;  %v463_v43 = vmax.f32 %v425_v34, 0.0 }
  0xff   : > { %v480_v38 = vadd.f32 %v464_v28, %v1232_v31  ;;  %v440_v39 = vadd.f32 %v996_v35, %v1163_v33  ;;  %v434_v47 = vpop.f32.mrb[13].mxu0 }
 0x100   : > { %v479_v51 = vadd.f32 %v463_v43, %v1232_v31  ;;  %v435_v52 = vadd.f32 %v1163_v33, %v434_v47 }
 0x101   : > { %497 = vst.msk [vmem:[%s1178_s8 + $0x58] sm:$0xff] %vm485_vm2, %v480_v38  ;;  %v466_v46 = vmax.f32 %v440_v39, 0.0 }
 0x102   : > { %v999_v53 = vpop.f32.mrb[14].mxu0  ;;  %496 = vst.msk [vmem:[%s1178_s8 + $0x50] sm:$0xff] %vm485_vm2, %v479_v51  ;;  %v465_v61 = vmax.f32 %v435_v52, 0.0 }
 0x103   : > { %v482_v56 = vadd.f32 %v466_v46, %v1249_v50  ;;  %v450_v57 = vadd.f32 %v999_v53, %v1163_v33  ;;  %v444_v2 = vpop.f32.mrb[15].mxu0 }
 0x104   : > { %v481_v5 = vadd.f32 %v465_v61, %v1249_v50  ;;  %v445_v6 = vadd.f32 %v1163_v33, %v444_v2 }
 0x105   : > { %499 = vst.msk [vmem:[%s1178_s8 + $0x68] sm:$0xff] %vm485_vm2, %v482_v56  ;;  %v468_v1 = vmax.f32 %v450_v57, 0.0 }
 0x106   : > { %498 = vst.msk [vmem:[%s1178_s8 + $0x60] sm:$0xff] %vm485_vm2, %v481_v5  ;;  %v467_v12 = vmax.f32 %v445_v6, 0.0 }
 0x15b   : > { %v1004_v4 = vpop.f32.mrb[0].mxu1 }
 0x15c   : > { %v638_v7 = vadd.f32 %v1004_v4, %v1163_v33  ;;  %v632_v8 = vpop.f32.mrb[1].mxu1  ;;  %v248_v4 = vld [vmem:[%s1168_s5 + $0x38] sm:$0xff] }
 0x15d   : > { %v633_v10 = vadd.f32 %v1163_v33, %v632_v8  ;;  %v483_v17 = vadd.f32 %v467_v12, %v248_v4 }
 0x15e   : > { %v712_v13 = vmax.f32 %v638_v7, 0.0 }
 0x15f   : > { %v711_v18 = vmax.f32 %v633_v10, 0.0  ;;  %v1007_v19 = vpop.f32.mrb[2].mxu1  ;;  %500 = vst.msk [vmem:[%s1178_s8 + $0x70] sm:$0xff] %vm485_vm2, %v483_v17 }
 0x160   : > { %v728_v22 = vadd.f32 %v712_v13, %v241_v42  ;;  %v648_v23 = vadd.f32 %v1007_v19, %v1163_v33  ;;  %v642_v24 = vpop.f32.mrb[3].mxu1 }
 0x161   : > { %v727_v26 = vadd.f32 %v711_v18, %v241_v42  ;;  %v643_v27 = vadd.f32 %v1163_v33, %v642_v24 }
 0x162   : > { %v714_v30 = vmax.f32 %v648_v23, 0.0  ;;  %761 = vrot.lane.b32.xlu1 %v728_v22, %s1045_s9 }
 0x163   : > { %v713_v36 = vmax.f32 %v643_v27, 0.0  ;;  %v1010_v37 = vpop.f32.mrb[4].mxu1  ;;  %759 = vrot.lane.b32.xlu0 %v727_v26, %s1045_s9 }
 0x164   : > { %v730_v40 = vadd.f32 %v714_v30, %v1184_v49  ;;  %v658_v41 = vadd.f32 %v1010_v37, %v1163_v33  ;;  %v652_v42 = vpop.f32.mrb[5].mxu1 }
 0x165   : > { %v729_v44 = vadd.f32 %v713_v36, %v1184_v49  ;;  %v653_v45 = vadd.f32 %v1163_v33, %v652_v42 }
 0x166   : > { %v716_v48 = vmax.f32 %v658_v41, 0.0  ;;  %765 = vrot.lane.b32.xlu1 %v730_v40, %s1045_s9 }
 0x167   : > { %v715_v55 = vmax.f32 %v653_v45, 0.0  ;;  %v1013_v49 = vpop.f32.mrb[6].mxu1  ;;  %763 = vrot.lane.b32.xlu0 %v729_v44, %s1045_s9 }
 0x168   : > { %v732_v58 = vadd.f32 %v716_v48, %v1190_v54  ;;  %v668_v59 = vadd.f32 %v1013_v49, %v1163_v33  ;;  %v662_v60 = vpop.f32.mrb[7].mxu1 }
 0x169   : > { %v731_v62 = vadd.f32 %v715_v55, %v1190_v54  ;;  %v663_v63 = vadd.f32 %v1163_v33, %v662_v60  ;;  %v484_v54 = vadd.f32 %v468_v1, %v248_v4 }
 0x16a   : > { %v718_v3 = vmax.f32 %v668_v59, 0.0  ;;  %769 = vrot.lane.b32.xlu1 %v732_v58, %s1045_s9 }
 0x16b   : > { %v717_v7 = vmax.f32 %v663_v63, 0.0  ;;  %v1016_v8 = vpop.f32.mrb[8].mxu1  ;;  %767 = vrot.lane.b32.xlu0 %v731_v62, %s1045_s9  ;;  %501 = vst.msk [vmem:[%s1178_s8 + $0x78] sm:$0xff] %vm485_vm2, %v484_v54 }
 0x16c   : > { %v734_v9 = vadd.f32 %v718_v3, %v1205_v0  ;;  %v678_v10 = vadd.f32 %v1016_v8, %v1163_v33  ;;  %v672_v11 = vpop.f32.mrb[9].mxu1 }
 0x16d   : > { %v733_v13 = vadd.f32 %v717_v7, %v1205_v0  ;;  %v673_v15 = vadd.f32 %v1163_v33, %v672_v11 }
 0x16e   : > { %v720_v16 = vmax.f32 %v678_v10, 0.0  ;;  %773 = vrot.lane.b32.xlu1 %v734_v9, %s1045_s9 }
 0x16f   : > { %v719_v18 = vmax.f32 %v673_v15, 0.0  ;;  %v1019_v19 = vpop.f32.mrb[10].mxu1  ;;  %771 = vrot.lane.b32.xlu0 %v733_v13, %s1045_s9 }
 0x170   : > { %v736_v20 = vadd.f32 %v720_v16, %v1218_v14  ;;  %v688_v21 = vadd.f32 %v1019_v19, %v1163_v33  ;;  %v682_v22 = vpop.f32.mrb[11].mxu1 }
 0x171   : > { %v735_v0 = vadd.f32 %v719_v18, %v1218_v14  ;;  %v683_v23 = vadd.f32 %v1163_v33, %v682_v22 }
 0x172   : > { %v722_v24 = vmax.f32 %v688_v21, 0.0  ;;  %777 = vrot.lane.b32.xlu1 %v736_v20, %s1045_s9 }
 0x173   : > { %v721_v25 = vmax.f32 %v683_v23, 0.0  ;;  %v1022_v26 = vpop.f32.mrb[12].mxu1  ;;  %775 = vrot.lane.b32.xlu0 %v735_v0, %s1045_s9 }
 0x174   : > { %v738_v27 = vadd.f32 %v722_v24, %v1232_v31  ;;  %v698_v28 = vadd.f32 %v1022_v26, %v1163_v33  ;;  %v692_v29 = vpop.f32.mrb[13].mxu1 }
 0x175   : > { %v737_v30 = vadd.f32 %v721_v25, %v1232_v31  ;;  %v693_v32 = vadd.f32 %v1163_v33, %v692_v29 }
 0x176   : > { %v724_v34 = vmax.f32 %v698_v28, 0.0  ;;  %781 = vrot.lane.b32.xlu1 %v738_v27, %s1045_s9 }
 0x177   : > { %v723_v14 = vmax.f32 %v693_v32, 0.0  ;;  %v1025_v35 = vpop.f32.mrb[14].mxu1  ;;  %779 = vrot.lane.b32.xlu0 %v737_v30, %s1045_s9 }
 0x178   : > { %v740_v36 = vadd.f32 %v724_v34, %v1249_v50  ;;  %v708_v37 = vadd.f32 %v1025_v35, %v1163_v33  ;;  %v702_v38 = vpop.f32.mrb[15].mxu1 }
 0x179   : > { %v739_v39 = vadd.f32 %v723_v14, %v1249_v50  ;;  %v703_v31 = vadd.f32 %v1163_v33, %v702_v38 }
 0x17a   : > { %v726_v40 = vmax.f32 %v708_v37, 0.0  ;;  %785 = vrot.lane.b32.xlu1 %v740_v36, %s1045_s9 }
 0x17b   : > { %v725_v41 = vmax.f32 %v703_v31, 0.0  ;;  %783 = vrot.lane.b32.xlu0 %v739_v39, %s1045_s9 }
 0x17c   : > { %v742_v42 = vadd.f32 %v726_v40, %v248_v4 }
 0x17d   : > { %v741_v43 = vadd.f32 %v725_v41, %v248_v4 }
 0x17e   : > { %789 = vrot.lane.b32.xlu1 %v742_v42, %s1045_s9 }
 0x17f   : > { %787 = vrot.lane.b32.xlu0 %v741_v43, %s1045_s9 }
 0x1d4   : > { %v762_v44 = vpop.permute.xlu1 %761 }
 0x1d5   : > { %809 = vst.msk [vmem:[%s1178_s8 + $0x8] sm:$0xff] %vm807_vm3, %v762_v44  ;;  %v760_v33 = vpop.permute.xlu0 %759 }
 0x1d6   : > { %808 = vst.msk [vmem:[%s1178_s8] sm:$0xff] %vm807_vm3, %v760_v33 }
 0x1d8   : > { %v766_v45 = vpop.permute.xlu1 %765 }
 0x1d9   : > { %811 = vst.msk [vmem:[%s1178_s8 + $0x18] sm:$0xff] %vm807_vm3, %v766_v45  ;;  %v764_v46 = vpop.permute.xlu0 %763 }
 0x1da   : > { %810 = vst.msk [vmem:[%s1178_s8 + $0x10] sm:$0xff] %vm807_vm3, %v764_v46 }
 0x1dc   : > { %v770_v47 = vpop.permute.xlu1 %769 }
 0x1dd   : > { %813 = vst.msk [vmem:[%s1178_s8 + $0x28] sm:$0xff] %vm807_vm3, %v770_v47  ;;  %v768_v48 = vpop.permute.xlu0 %767 }
 0x1de   : > { %812 = vst.msk [vmem:[%s1178_s8 + $0x20] sm:$0xff] %vm807_vm3, %v768_v48 }
 0x1e0   : > { %v774_v50 = vpop.permute.xlu1 %773 }
 0x1e1   : > { %815 = vst.msk [vmem:[%s1178_s8 + $0x38] sm:$0xff] %vm807_vm3, %v774_v50  ;;  %v772_v51 = vpop.permute.xlu0 %771 }
 0x1e2   : > { %814 = vst.msk [vmem:[%s1178_s8 + $0x30] sm:$0xff] %vm807_vm3, %v772_v51 }
 0x1e4   : > { %v778_v52 = vpop.permute.xlu1 %777 }
 0x1e5   : > { %817 = vst.msk [vmem:[%s1178_s8 + $0x48] sm:$0xff] %vm807_vm3, %v778_v52  ;;  %v776_v53 = vpop.permute.xlu0 %775 }
 0x1e6   : > { %816 = vst.msk [vmem:[%s1178_s8 + $0x40] sm:$0xff] %vm807_vm3, %v776_v53 }
 0x1e8   : > { %v782_v55 = vpop.permute.xlu1 %781 }
 0x1e9   : > { %819 = vst.msk [vmem:[%s1178_s8 + $0x58] sm:$0xff] %vm807_vm3, %v782_v55  ;;  %v780_v49 = vpop.permute.xlu0 %779 }
 0x1ea   : > { %818 = vst.msk [vmem:[%s1178_s8 + $0x50] sm:$0xff] %vm807_vm3, %v780_v49 }
 0x1ec   : > { %v786_v56 = vpop.permute.xlu1 %785 }
 0x1ed   : > { %821 = vst.msk [vmem:[%s1178_s8 + $0x68] sm:$0xff] %vm807_vm3, %v786_v56  ;;  %v784_v57 = vpop.permute.xlu0 %783 }
 0x1ee   : > { %820 = vst.msk [vmem:[%s1178_s8 + $0x60] sm:$0xff] %vm807_vm3, %v784_v57 }
 0x1f0   : > { %v790_v58 = vpop.permute.xlu1 %789 }
 0x1f1   : > { %823 = vst.msk [vmem:[%s1178_s8 + $0x78] sm:$0xff] %vm807_vm3, %v790_v58  ;;  %v788_v59 = vpop.permute.xlu0 %787 }
 0x1f2   : > { %822 = vst.msk [vmem:[%s1178_s8 + $0x70] sm:$0xff] %vm807_vm3, %v788_v59 }
 0x1f3 PF: > { %s14_s15 = sadd.s32 1, %s1042_s15  }
 0x1f4   : > { %p11_p5 = scmp.ge.s32.totalorder %s14_s15, 4  }
 0x1f6   :  { %13 = sbr.rel (!%p11_p5) target bundleno = 1 (0x1), region = 69 }

</bundles_post_ra>
